<compile_context>
chip_gen: v6e
topology: v6e:2x2x1
jax: 0.10.0
libtpu: 0.0.40
codegen_flags: <defaults>
</compile_context>

<pallas_src>
import functools

import jax
import jax.numpy as jnp
from jax.experimental import pallas as pl
from jax.experimental.pallas import tpu as pltpu


def reinforce_loss_kernel(baseline_ref, reward_ref, disc_ref,
                          logpi_a_ref, logpi_l_ref, out_ref):
    """Fused episode reduction.

    baseline_ref : SMEM (1,)        f32
    reward_ref   : VMEM (1, B)      f32
    disc_ref     : VMEM (T, 1)      f32   trace-time constant gamma^(T-1-t)
    logpi_a_ref  : VMEM (T, B)      producer dtype
    logpi_l_ref  : VMEM (D, T, B)   producer dtype (D-major: no lane padding)
    out_ref      : VMEM (1, 128)    f32   lane0=a_loss, lane1=l_loss, lane2=b_loss
    """
    baseline = baseline_ref[0]                           # SMEM scalar

    reward = reward_ref[...].astype(jnp.float32)         # [1, B]
    disc = disc_ref[...]                                 # [T, 1]
    logpi_a = logpi_a_ref[...].astype(jnp.float32)       # [T, B]
    logpi_l = logpi_l_ref[...].astype(jnp.float32)       # [D, T, B]

    r_b = reward - baseline                              # [1, B]
    w = disc * r_b                                       # [T, B] (VPU broadcast-mul)

    a_loss = -jnp.sum(logpi_a * w, keepdims=True)        # (1, 1)
    # Fused l_loss: sum_{d,t,b} logpi_l[d,t,b] * w[t,b]
    #   == sum_t (logpi_l[t].sum(-1) * w[t]).sum()   (mathematically identical)
    # axis=0 reduce over the leading D axis is plain VPU adds (no XLU pass).
    l_loss = -jnp.sum(jnp.sum(logpi_l * w[None, :, :], axis=0), keepdims=True)
    b_loss = jnp.sum((baseline - reward) ** 2, keepdims=True)

    # Pack the three scalars into one lane-dense (1, 128) tile -> single store.
    lane = jax.lax.broadcasted_iota(jnp.int32, (1, 128), 1)
    out = jnp.zeros((1, 128), jnp.float32)
    out = jnp.where(lane == 0, a_loss, out)
    out = jnp.where(lane == 1, l_loss, out)
    out = jnp.where(lane == 2, b_loss, out)
    out_ref[...] = out


@functools.partial(jax.jit, static_argnames=("gamma",))
def reinforce_loss_pallas(reward, logpi_a_steps, logpi_l_steps, baseline, *, gamma):
    """reward: [B]; logpi_a_steps: tuple of T arrays [B];
    logpi_l_steps: tuple of T arrays [B, D]; baseline: (1,1) or scalar;
    gamma: static Python float."""
    T = len(logpi_a_steps)
    logpi_a_seq = jnp.stack(logpi_a_steps, axis=0)                # [T, B]
    logpi_l_seq = jnp.stack(logpi_l_steps, axis=0)                # [T, B, D]
    B = logpi_a_seq.shape[1]

    # D-major layout so the tiny D axis never maps to the 128-lane axis.
    logpi_l_dtb = jnp.transpose(logpi_l_seq, (2, 0, 1))           # [D, T, B]

    reward2d = jnp.reshape(reward, (1, B)).astype(jnp.float32)
    baseline_s = jnp.reshape(jnp.asarray(baseline, jnp.float32), (1,))

    # Discount weights as a trace-time constant (gamma is static, T is static).
    disc = jnp.asarray([gamma ** (T - 1 - t) for t in range(T)],
                       dtype=jnp.float32).reshape(T, 1)           # [T, 1]

    smem = pl.BlockSpec(memory_space=pltpu.MemorySpace.SMEM)
    vmem = pl.BlockSpec(memory_space=pltpu.MemorySpace.VMEM)

    out = pl.pallas_call(
        reinforce_loss_kernel,
        out_shape=jax.ShapeDtypeStruct((1, 128), jnp.float32),
        in_specs=[smem,   # baseline
                  vmem,   # reward   [1, B]
                  vmem,   # disc     [T, 1]
                  vmem,   # logpi_a  [T, B]
                  vmem],  # logpi_l  [D, T, B]
        out_specs=vmem,
    )(baseline_s, reward2d, disc, logpi_a_seq, logpi_l_dtb)
    return out[0, 0], out[0, 1], out[0, 2]


class LOSS:
    """JAX/Pallas port of the PyTorch LOSS module (forward pass)."""

    def __init__(self, gamma):
        self.baseline = jnp.zeros((1, 1), jnp.float32)   # learnable param
        self.gamma = float(gamma)
        self.notinit = True

    def initialize(self, B):
        self.t = 0
        self.logpi_l = []
        self.logpi_a = []

    def forward(self, reward, logpi_a, logpi_l, done):
        # Per-step work is a free Python list append; all device math happens
        # once per episode inside a single jitted program + pallas_call.
        self.logpi_l.append(logpi_l)
        self.logpi_a.append(logpi_a)
        if done:
            if self.notinit:
                # baseline.data = reward.mean()
                self.baseline = jnp.full((1, 1), jnp.mean(reward), jnp.float32)
                self.notinit = False
            return reinforce_loss_pallas(reward,
                                         tuple(self.logpi_a),
                                         tuple(self.logpi_l),
                                         self.baseline,
                                         gamma=self.gamma)
        return (0, 0, 0)


def loss_ref(reward, logpi_a_list, logpi_l_list, baseline, gamma):
    """Pure-JAX reference matching the PyTorch reversed-loop semantics."""
    a_loss = jnp.float32(0.0)
    l_loss = jnp.float32(0.0)
    R_b = reward - baseline
    for ll, la in zip(reversed(logpi_l_list), reversed(logpi_a_list)):
        a_loss += -(la * R_b).sum()
        l_loss += -(ll.sum(-1) * R_b).sum()
        R_b = gamma * R_b
    b_loss = ((baseline - reward) ** 2).sum()
    return a_loss, l_loss, b_loss


if __name__ == "__main__":
    key = jax.random.PRNGKey(0)
    B, T, D = 8, 6, 2          # batch, episode length, location dims
    gamma = 0.9

    loss_mod = LOSS(gamma)
    loss_mod.initialize(B)

    keys = jax.random.split(key, 2 * T + 1)
    reward = jax.random.uniform(keys[-1], (B,), jnp.float32)

    logpi_a_steps, logpi_l_steps = [], []
    outs = (0, 0, 0)
    for t in range(T):
        logpi_a = jax.random.normal(keys[2 * t], (B,), jnp.float32) - 1.0
        logpi_l = jax.random.normal(keys[2 * t + 1], (B, D), jnp.float32) - 1.0
        logpi_a_steps.append(logpi_a)
        logpi_l_steps.append(logpi_l)
        outs = loss_mod.forward(reward, logpi_a, logpi_l, done=(t == T - 1))

    a_loss, l_loss, b_loss = outs
    jax.block_until_ready((a_loss, l_loss, b_loss))

    # Cross-check against the pure-JAX reference (baseline was set to
    # reward.mean() on the first `done`, mirroring the PyTorch notinit path).
    baseline_val = jnp.mean(reward)
    ra, rl, rb = loss_ref(reward, logpi_a_steps, logpi_l_steps,
                          baseline_val, gamma)
    assert jnp.allclose(a_loss, ra, rtol=1e-5, atol=1e-4), (a_loss, ra)
    assert jnp.allclose(l_loss, rl, rtol=1e-5, atol=1e-4), (l_loss, rl)
    assert jnp.allclose(b_loss, rb, rtol=1e-5, atol=1e-4), (b_loss, rb)

    print("KERNEL_OK")
</pallas_src>

<mosaic_0001>
module attributes {stable_mosaic.version = 11 : i64} {
  func.func @reinforce_loss_kernel(%arg0: memref<1xf32, #tpu.memory_space<smem>>, %arg1: memref<1x8xf32, #tpu.memory_space<vmem>>, %arg2: memref<6x1xf32, #tpu.memory_space<vmem>>, %arg3: memref<6x8xf32, #tpu.memory_space<vmem>>, %arg4: memref<2x6x8xf32, #tpu.memory_space<vmem>>, %arg5: memref<1x128xf32, #tpu.memory_space<vmem>>) attributes {dimension_semantics = [], scalar_prefetch = 0 : i64, scratch_operands = 0 : i64, tpu.core_type = #tpu.core_type<tc>} {
    %c0 = arith.constant 0 : index
    %0 = memref.load %arg0[%c0] : memref<1xf32, #tpu.memory_space<smem>>
    %c0_0 = arith.constant 0 : index
    %c0_1 = arith.constant 0 : index
    %1 = vector.load %arg1[%c0_0, %c0_1] : memref<1x8xf32, #tpu.memory_space<vmem>>, vector<1x8xf32>
    %c0_2 = arith.constant 0 : index
    %c0_3 = arith.constant 0 : index
    %2 = vector.load %arg2[%c0_2, %c0_3] : memref<6x1xf32, #tpu.memory_space<vmem>>, vector<6x1xf32>
    %c0_4 = arith.constant 0 : index
    %c0_5 = arith.constant 0 : index
    %3 = vector.load %arg3[%c0_4, %c0_5] : memref<6x8xf32, #tpu.memory_space<vmem>>, vector<6x8xf32>
    %c0_6 = arith.constant 0 : index
    %c0_7 = arith.constant 0 : index
    %c0_8 = arith.constant 0 : index
    %4 = vector.load %arg4[%c0_6, %c0_7, %c0_8] : memref<2x6x8xf32, #tpu.memory_space<vmem>>, vector<2x6x8xf32>
    %5 = vector.broadcast %0 : f32 to vector<1x8xf32>
    %6 = arith.subf %1, %5 : vector<1x8xf32>
    %7 = vector.broadcast %2 : vector<6x1xf32> to vector<6x8xf32>
    %8 = vector.broadcast %6 : vector<1x8xf32> to vector<6x8xf32>
    %9 = arith.mulf %7, %8 : vector<6x8xf32>
    %10 = arith.mulf %3, %9 : vector<6x8xf32>
    %11 = vector.shape_cast %10 : vector<6x8xf32> to vector<1x6x8xf32>
    %cst = arith.constant dense<0.000000e+00> : vector<1xf32>
    %12 = vector.multi_reduction <add>, %11, %cst [1, 2] : vector<1x6x8xf32> to vector<1xf32>
    %13 = vector.shape_cast %12 : vector<1xf32> to vector<1x1x1xf32>
    %14 = vector.extract %13[0, 0, 0] : f32 from vector<1x1x1xf32>
    %15 = vector.broadcast %14 : f32 to vector<1x1xf32>
    %cst_9 = arith.constant 0.000000e+00 : f32
    %16 = vector.broadcast %cst_9 : f32 to vector<1x1xf32>
    %17 = arith.subf %16, %15 : vector<1x1xf32>
    %18 = vector.shape_cast %9 : vector<6x8xf32> to vector<1x6x8xf32>
    %19 = vector.broadcast %18 : vector<1x6x8xf32> to vector<2x6x8xf32>
    %20 = arith.mulf %4, %19 : vector<2x6x8xf32>
    %cst_10 = arith.constant dense<0.000000e+00> : vector<6x8xf32>
    %21 = vector.multi_reduction <add>, %20, %cst_10 [0] : vector<2x6x8xf32> to vector<6x8xf32>
    %22 = vector.shape_cast %21 : vector<6x8xf32> to vector<1x6x8xf32>
    %cst_11 = arith.constant dense<0.000000e+00> : vector<1xf32>
    %23 = vector.multi_reduction <add>, %22, %cst_11 [1, 2] : vector<1x6x8xf32> to vector<1xf32>
    %24 = vector.shape_cast %23 : vector<1xf32> to vector<1x1x1xf32>
    %25 = vector.extract %24[0, 0, 0] : f32 from vector<1x1x1xf32>
    %26 = vector.broadcast %25 : f32 to vector<1x1xf32>
    %cst_12 = arith.constant 0.000000e+00 : f32
    %27 = vector.broadcast %cst_12 : f32 to vector<1x1xf32>
    %28 = arith.subf %27, %26 : vector<1x1xf32>
    %29 = vector.broadcast %0 : f32 to vector<1x8xf32>
    %30 = arith.subf %29, %1 : vector<1x8xf32>
    %31 = arith.mulf %30, %30 : vector<1x8xf32>
    %32 = vector.shape_cast %31 : vector<1x8xf32> to vector<1x1x8xf32>
    %cst_13 = arith.constant dense<0.000000e+00> : vector<1xf32>
    %33 = vector.multi_reduction <add>, %32, %cst_13 [1, 2] : vector<1x1x8xf32> to vector<1xf32>
    %34 = vector.shape_cast %33 : vector<1xf32> to vector<1x1x1xf32>
    %35 = vector.extract %34[0, 0, 0] : f32 from vector<1x1x1xf32>
    %36 = vector.broadcast %35 : f32 to vector<1x1xf32>
    %37 = tpu.iota {dimensions = array<i32: 1>} : vector<1x128xi32>
    %cst_14 = arith.constant 0.000000e+00 : f32
    %38 = vector.broadcast %cst_14 : f32 to vector<1x128xf32>
    %c0_i32 = arith.constant 0 : i32
    %39 = vector.broadcast %c0_i32 : i32 to vector<1x128xi32>
    %40 = arith.cmpi eq, %37, %39 : vector<1x128xi32>
    %41 = vector.shape_cast %17 : vector<1x1xf32> to vector<1x1xf32>
    %42 = vector.broadcast %41 : vector<1x1xf32> to vector<1x128xf32>
    %43 = arith.select %40, %42, %38 : vector<1x128xi1>, vector<1x128xf32>
    %c1_i32 = arith.constant 1 : i32
    %44 = vector.broadcast %c1_i32 : i32 to vector<1x128xi32>
    %45 = arith.cmpi eq, %37, %44 : vector<1x128xi32>
    %46 = vector.shape_cast %28 : vector<1x1xf32> to vector<1x1xf32>
    %47 = vector.broadcast %46 : vector<1x1xf32> to vector<1x128xf32>
    %48 = arith.select %45, %47, %43 : vector<1x128xi1>, vector<1x128xf32>
    %c2_i32 = arith.constant 2 : i32
    %49 = vector.broadcast %c2_i32 : i32 to vector<1x128xi32>
    %50 = arith.cmpi eq, %37, %49 : vector<1x128xi32>
    %51 = vector.shape_cast %36 : vector<1x1xf32> to vector<1x1xf32>
    %52 = vector.broadcast %51 : vector<1x1xf32> to vector<1x128xf32>
    %53 = arith.select %50, %52, %48 : vector<1x128xi1>, vector<1x128xf32>
    %c0_15 = arith.constant 0 : index
    %c0_16 = arith.constant 0 : index
    %54 = vector.load %arg5[%c0_15, %c0_16] : memref<1x128xf32, #tpu.memory_space<vmem>>, vector<1x128xf32>
    tpu.vector_store %arg5[%c0_15, %c0_16], %53 {strides = array<i32>} : memref<1x128xf32, #tpu.memory_space<vmem>>, vector<1x128xf32>,
    return
  }
}

</mosaic_0001>

<bundles_post_ra>
// kernel: reinforce_loss_pallas.1
= control target key start
LH: loop header
LB: loop body
LE: loop exit
PB: predicated region body
PF: predicated region fallthrough
CT: control target
= control target key end

     0   :  { %v107_v0 = vmov 0   ;;  %v35_v2 = vlaneseq  ;;  %vm42_vm0 = vcmask 62464   ;;  %vm74_vm1 = vcmask 57344   ;;  %s159_s2 = inlined_call_operand.vmem [shape: f32[6,1], index: 2, kind: input, shape index: {}]   ;;  %s160_s0 = inlined_call_operand.<no memory space> [shape: f32[1], index: 0, kind: input, shape index: {}]   ;;  %s161_s1 = inlined_call_operand.vmem [shape: f32[1,8], index: 1, kind: input, shape index: {}]   ;;  %s162_s3 = inlined_call_operand.vmem [shape: f32[6,8], index: 3, kind: input, shape index: {}]   ;;  %s163_s4 = inlined_call_operand.vmem [shape: f32[2,6,8], index: 4, kind: input, shape index: {}]   ;;  %s164_s5 = inlined_call_operand.vmem [shape: f32[1,128], index: 5, kind: output, shape index: {}]  }
   0x1   :  { %106 = vset.pattern.permute.xlu0 %v107_v0  ;;  %v23_v1 = vld [vmem:[%s159_s2] sm:$0x3f]  ;;  %v27_v5 = vstv %s160_s0  ;;  %v26_v12 = vld [vmem:[%s163_s4 + $0x8] sm:$0x3f] }
   0x2   :  { %31 = vperm.xlu0 %106, %v23_v1   ;;  %v36_v3 = vshrl.u32 %v35_v2, 7  ;;  %v22_v4 = vld [vmem:[%s161_s1] sm:$0x1]  ;;  %v86_v46 = vand.u32 127, %v35_v2 }
   0x3   :  { %v28_v7 = vsub.f32 %v22_v4, %v27_v5  ;;  %v24_v10 = vld [vmem:[%s162_s3] sm:$0x3f]  ;;  %v72_v14 = vsub.f32 %v27_v5, %v22_v4 }
   0x4   :  { %v37_v6 = vsub.s32 0, %v36_v3  ;;  %v25_v11 = vld [vmem:[%s163_s4] sm:$0x3f]  ;;  %vm87_vm2 = vcmp.eq.s32.totalorder %v86_v46, 0  ;;  %vm89_vm3 = vcmp.eq.s32.totalorder %v86_v46, 1  ;;  %vm91_vm4 = vcmp.eq.s32.totalorder %v86_v46, 2 }
   0x5   :  { %v73_v22 = vmul.f32 %v72_v14, %v72_v14 }
   0x6   :  { %v38_v8 = vrot.slane %v28_v7, %v37_v6 }
   0x7   :  { %v75_v24 = vsel %vm74_vm1, %v73_v22, 0.0 }
  0x7d   :  { %v32_v9 = vpop.permute.xlu0 %31 }
  0x7e   :  { %v40_v13 = vmul.f32 %v38_v8, %v32_v9 }
  0x80   :  { %v41_v15 = vmul.f32 %v40_v13, %v24_v10  ;;  %v55_v16 = vmul.f32 %v40_v13, %v25_v11  ;;  %v56_v17 = vmul.f32 %v40_v13, %v26_v12 }
  0x82   :  { %v43_v18 = vsel %vm42_vm0, %v41_v15, 0.0  ;;  %v57_v19 = vsel %vm42_vm0, %v55_v16, 0.0  ;;  %v58_v20 = vsel %vm42_vm0, %v56_v17, 0.0 }
  0x83   :  { %44 = vadd.xlane.f32.xlu0 %v43_v18  ;;  %v59_v21 = vadd.f32 %v58_v20, %v57_v19 }
  0x85   :  { %v60_v23 = vsel %vm42_vm0, %v59_v21, 0.0 }
  0x86   :  { %61 = vadd.xlane.f32.xlu1 %v60_v23 }
  0x8a   :  { %76 = vadd.xlane.f32.xlu1 %v75_v24 }
 0x10c   :  { %v45_v25 = vpop.xlane.xlu0 %44 }
 0x10d   :  { %v46_v26 = vrot.slane %v45_v25, 4 }
 0x10f   :  { %v47_v27 = vadd.f32 %v46_v26, %v45_v25  ;;  %v62_v28 = vpop.xlane.xlu1 %61 }
 0x110   :  { %v63_v29 = vrot.slane %v62_v28, 4 }
 0x111   :  { %v48_v30 = vrot.slane %v47_v27, 2 }
 0x112   :  { %v64_v31 = vadd.f32 %v63_v29, %v62_v28 }
 0x113   :  { %v77_v32 = vpop.xlane.xlu1 %76  ;;  %v49_v33 = vadd.f32 %v48_v30, %v47_v27 }
 0x114   :  { %v65_v34 = vrot.slane %v64_v31, 2  ;;  %v78_v35 = vrot.slane %v77_v32, 4 }
 0x115   :  { %v50_v36 = vrot.slane %v49_v33, 1 }
 0x116   :  { %v79_v37 = vadd.f32 %v78_v35, %v77_v32  ;;  %v66_v38 = vadd.f32 %v65_v34, %v64_v31 }
 0x117   :  { %v51_v39 = vadd.f32 %v50_v36, %v49_v33 }
 0x118   :  { %v80_v40 = vrot.slane %v79_v37, 2  ;;  %v67_v41 = vrot.slane %v66_v38, 1 }
 0x119   :  { %99 = vpush %v51_v39 }
 0x11a   :  { %v81_v42 = vadd.f32 %v80_v40, %v79_v37  ;;  %v68_v43 = vadd.f32 %v67_v41, %v66_v38 }
 0x11c   :  { %101 = vpush %v68_v43  ;;  %v82_v44 = vrot.slane %v81_v42, 1 }
 0x11e   :  { %v83_v45 = vadd.f32 %v82_v44, %v81_v42 }
 0x120   :  { %103 = vpush %v83_v45 }
 0x14a   :  { %s100_s0 = spop %99 }
 0x14b   :  { %v53_v47 = vstv %s100_s0 }
 0x14c   :  { %v54_v48 = vsub.f32 0.0, %v53_v47 }
 0x14d   :  { %s102_s1 = spop %101 }
 0x14e   :  { %v70_v49 = vstv %s102_s1  ;;  %v88_v51 = vsel %vm87_vm2, %v54_v48, 0.0 }
 0x14f   :  { %v71_v50 = vsub.f32 0.0, %v70_v49 }
 0x151   :  { %s104_s3 = spop %103  ;;  %v90_v52 = vsel %vm89_vm3, %v71_v50, %v88_v51 }
 0x152   :  { %v92_v53 = vstv %s104_s3 }
 0x153   :  { %v93_v54 = vsel %vm91_vm4, %v92_v53, %v90_v52 }
 0x154   :  { %94 = vst [vmem:[%s164_s5] sm:$0x1] %v93_v54 }

</bundles_post_ra>
